<compile_context>
chip_gen: v7x
topology: tpu7x:2x2x1
jax: 0.10.0
libtpu: 0.0.40
codegen_flags: <defaults>
</compile_context>

<pallas_src>
import math

import jax
import jax.numpy as jnp
import numpy as np
from jax.experimental import pallas as pl
from jax.experimental.pallas import tpu as pltpu


def _masked_ce_kernel(preds_ref, aux_ref, out_ref):
    """Partial sum over one (C, tT) tile of per-frame CE of (pred*mask) vs (gt*mask)."""
    p = preds_ref[0]                      # (C, tT), source dtype (f32 / bf16)
    aux = aux_ref[0]                      # (2, tT) int32
    tgt = aux[0:1, :]                     # masked target class per frame
    code = aux[1:2, :]                    # 0 = padded frame, 1 = mask==0, 2 = mask==1

    C = p.shape[0]

    # logsumexp over the class (sublane) axis of the RAW logits: one max / exp / sum.
    mx = jnp.max(p, axis=0, keepdims=True)                                    # (1, tT)
    ssum = jnp.sum(jnp.exp((p - mx).astype(jnp.float32)), axis=0, keepdims=True)
    lse = mx.astype(jnp.float32) + jnp.log(ssum)                              # (1, tT)

    # Target-class logit via one-hot compare + sublane reduce (no gather needed).
    cls = jax.lax.broadcasted_iota(jnp.int32, p.shape, 0)
    picked = jnp.sum(jnp.where(cls == tgt, p, jnp.zeros_like(p)),
                     axis=0, keepdims=True).astype(jnp.float32)               # (1, tT)

    # Mask applied at the (1, T) level: masked frames contribute exactly log(C)
    # (PyTorch CE over zeroed logits); padded frames (beyond the real T) contribute 0.
    log_c = math.log(C)
    ce = jnp.where(code == 2, lse - picked,
                   jnp.where(code == 1, log_c, 0.0))                          # (1, tT)

    tile_sum = jnp.sum(ce, axis=1, keepdims=True)                             # (1, 1)
    out_ref[...] = jnp.broadcast_to(tile_sum.reshape(1, 1, 1), out_ref.shape)


def _choose_t_tile(C, T, itemsize, t_tile):
    """Pick the time-tile width (multiple of 128, or the full T for small problems)."""
    if t_tile is not None:
        tT = int(t_tile)
    elif C * T * itemsize <= 8 * 1024 * 1024 or T < 256:
        tT = T                                            # one tile per batch element
    else:
        tT = max(512, (4 * 1024 * 1024 // (C * itemsize)) // 128 * 128)
        tT = min(tT, -(-T // 128) * 128)
    assert tT == T or tT % 128 == 0, "time tile must be a multiple of 128 (or == T)"
    nT = -(-T // tT)
    return tT, nT, nT * tT


def boundary_regression_loss(preds, gts, masks, *,
                             ce: bool = True, bce: bool = True,
                             focal: bool = False, mse: bool = False,
                             gamma: float = 2.0, alpha: float = 0.25,
                             t_tile=None):
    """Pallas port of BoundaryRegressionLoss.forward (weight=None)."""
    N, C, T = preds.shape
    itemsize = preds.dtype.itemsize
    tT, nT, T_pad = _choose_t_tile(C, T, itemsize, t_tile)

    # Tiny (N, 2, T_pad) side input: row 0 = (gt * mask).long(), row 1 = frame code
    # (0 = padded-out frame, 1 = real frame with mask==0, 2 = real frame with mask==1).
    gts2 = gts.reshape(N, T).astype(jnp.int32)
    mask_i = masks.reshape(N, T).astype(jnp.int32)
    aux = jnp.stack([gts2 * mask_i, 1 + mask_i], axis=1)        # (N, 2, T) int32
    if T_pad > T:
        aux = jnp.pad(aux, ((0, 0), (0, 0), (0, T_pad - T)))    # code==0 on the pad
    # preds stays un-padded / un-cast: a partial edge block (if any) reads undefined
    # tail lanes which the code==0 select discards, so the big tensor is never copied.

    # Explicit VMEM budget: double-buffered blocks + ~4 f32 (C, tT) temporaries + slack,
    # capped at 3/4 of the chip's physical VMEM (v5e/v6e 128 MiB, v7x 64 MiB).
    preds_blk = C * tT * itemsize
    aux_blk = 2 * tT * 4
    out_blk = 128 * 4
    need = 2 * (preds_blk + aux_blk + out_blk) + 4 * C * tT * 4 + (4 << 20)
    try:
        vmem_cap = int(pltpu.get_tpu_info().vmem_capacity_bytes)
    except Exception:
        vmem_cap = 64 * 1024 * 1024
    vmem_limit = int(min(max(need, 16 << 20), vmem_cap * 3 // 4))

    out = pl.pallas_call(
        _masked_ce_kernel,
        out_shape=jax.ShapeDtypeStruct((N, 1, nT * 128), jnp.float32),
        grid_spec=pltpu.PrefetchScalarGridSpec(
            num_scalar_prefetch=0,
            grid=(N, nT),
            in_specs=[
                pl.BlockSpec((1, C, tT), lambda b, j: (b, 0, j)),   # logits
                pl.BlockSpec((1, 2, tT), lambda b, j: (b, 0, j)),   # target + frame code
            ],
            out_specs=pl.BlockSpec((1, 1, 128), lambda b, j: (b, 0, j)),
        ),
        compiler_params=pltpu.CompilerParams(
            dimension_semantics=("parallel", "parallel"),
            vmem_limit_bytes=vmem_limit),
    )(preds, aux)

    # Per-batch mean CE over ALL T frames (masked frames count as log(C), exactly like
    # PyTorch's CE over zeroed logits -- do NOT "fix" this to divide by unmasked count).
    per_tile = out.reshape(N, nT, 128)[:, :, 0]                  # (N, nT)
    ce_per = jnp.sum(per_tile, axis=1) * (1.0 / T)               # (N,)

    loss = jnp.float32(0.0)
    n_plain_ce = int(ce) + int(bce)          # both branches append nn.CrossEntropyLoss
    if n_plain_ce:
        loss = loss + n_plain_ce * jnp.sum(ce_per)
    if focal:
        # FocalLoss: its criterion reduces to the per-element mean CE first (n == 1
        # after unsqueeze so batch_average divides by 1), then the focal transform.
        logpt = -ce_per
        pt = jnp.exp(logpt)
        loss = loss + jnp.sum(-((1.0 - pt) ** gamma) * (alpha * logpt))
    if mse:
        # TODO(synk): nn.MSELoss between float (1, C, T) logits and a long (1, T) target
        # is a dtype/shape error in PyTorch, so there is no faithful equivalent to port.
        pass
    return loss / N


def _reference_numpy(preds, gts, masks, *, ce=True, bce=True,
                     focal=False, gamma=2.0, alpha=0.25):
    """Literal numpy transcription of the PyTorch forward (ce / bce / focal paths)."""
    preds = np.asarray(preds, dtype=np.float64)
    gts = np.asarray(gts)
    masks = np.asarray(masks)
    N, C, T = preds.shape

    def mean_ce(p, t):
        mx = p.max(axis=0, keepdims=True)
        lse = mx + np.log(np.exp(p - mx).sum(axis=0, keepdims=True))
        return float(np.mean(lse[0] - p[t, np.arange(T)]))

    total = 0.0
    n_plain = int(ce) + int(bce)
    for b in range(N):
        m = masks[b].reshape(T).astype(np.float64)
        p = preds[b] * m[None, :]
        t = (gts[b].reshape(T) * masks[b].reshape(T)).astype(np.int64)
        ce_b = mean_ce(p, t)
        total += n_plain * ce_b
        if focal:
            logpt = -ce_b
            pt = np.exp(logpt)
            total += -((1.0 - pt) ** gamma) * (alpha * logpt)
    return total / N


if __name__ == "__main__":
    key = jax.random.PRNGKey(0)
    k1, k2, k3, k4, k5, k6 = jax.random.split(key, 6)

    # NOTE: the module docstring says (N, 1, T), but nn.CrossEntropyLoss over
    # `pred * mask` only runs with (N, C, T) class logits and (N, T) integer targets;
    # that is the shape combination implemented (and tested) here.
    N, C, T = 2, 4, 16
    preds = jax.random.normal(k1, (N, C, T), dtype=jnp.float32)
    gts = jax.random.randint(k2, (N, T), 0, C).astype(jnp.int32)
    masks = jax.random.bernoulli(k3, 0.75, (N, T))
    masks = masks.at[0, 3].set(False).at[1, 0].set(True)   # deterministic mixed mask

    out = jax.block_until_ready(boundary_regression_loss(preds, gts, masks))
    ref = _reference_numpy(preds, gts, masks)
    assert np.allclose(float(out), ref, rtol=1e-5, atol=1e-5), (float(out), ref)

    out_f = jax.block_until_ready(
        boundary_regression_loss(preds, gts, masks, focal=True))
    ref_f = _reference_numpy(preds, gts, masks, focal=True)
    assert np.allclose(float(out_f), ref_f, rtol=1e-5, atol=1e-5), (float(out_f), ref_f)

    # Non-aligned shape (C not a multiple of 8, T not a multiple of 128) with a forced
    # time tile, exercising the multi-tile grid, padded aux, and the partial edge block.
    N2, C2, T2 = 2, 19, 1000
    preds2 = jax.random.normal(k4, (N2, C2, T2), dtype=jnp.float32)
    gts2 = jax.random.randint(k5, (N2, T2), 0, C2).astype(jnp.int32)
    masks2 = jax.random.bernoulli(k6, 0.7, (N2, T2))
    out2 = jax.block_until_ready(
        boundary_regression_loss(preds2, gts2, masks2, t_tile=512))
    ref2 = _reference_numpy(preds2, gts2, masks2)
    assert np.allclose(float(out2), ref2, rtol=1e-4, atol=1e-5), (float(out2), ref2)

    print("KERNEL_OK")
</pallas_src>

<mosaic_0001>
module attributes {stable_mosaic.version = 11 : i64} {
  func.func @_masked_ce_kernel(%arg0: i32, %arg1: i32, %arg2: memref<1x4x16xf32, #tpu.memory_space<vmem>>, %arg3: memref<1x2x16xi32, #tpu.memory_space<vmem>>, %arg4: memref<1x1x128xf32, #tpu.memory_space<vmem>>) attributes {dimension_semantics = [#tpu.dimension_semantics<parallel>, #tpu.dimension_semantics<parallel>], iteration_bounds = array<i64: 2, 1>, scalar_prefetch = 0 : i64, scratch_operands = 0 : i64, tpu.core_type = #tpu.core_type<tc>, window_params = [{transform_indices = @transform_0, window_bounds = array<i64: 1, 4, 16>}, {transform_indices = @transform_1, window_bounds = array<i64: 1, 2, 16>}, {transform_indices = @transform_2, window_bounds = array<i64: 1, 1, 128>}]} {
    %c0 = arith.constant 0 : index
    %c0_0 = arith.constant 0 : index
    %c0_1 = arith.constant 0 : index
    %0 = vector.load %arg2[%c0, %c0_0, %c0_1] : memref<1x4x16xf32, #tpu.memory_space<vmem>>, vector<1x4x16xf32>
    %1 = vector.shape_cast %0 : vector<1x4x16xf32> to vector<4x16xf32>
    %c0_2 = arith.constant 0 : index
    %c0_3 = arith.constant 0 : index
    %c0_4 = arith.constant 0 : index
    %2 = vector.load %arg3[%c0_2, %c0_3, %c0_4] : memref<1x2x16xi32, #tpu.memory_space<vmem>>, vector<1x2x16xi32>
    %3 = vector.shape_cast %2 : vector<1x2x16xi32> to vector<2x16xi32>
    %4 = vector.extract_strided_slice %3 {offsets = [0, 0], sizes = [1, 16], strides = [1, 1]} : vector<2x16xi32> to vector<1x16xi32>
    %5 = vector.extract_strided_slice %3 {offsets = [1, 0], sizes = [1, 16], strides = [1, 1]} : vector<2x16xi32> to vector<1x16xi32>
    %cst = arith.constant dense<0xFF800000> : vector<16xf32>
    %6 = vector.multi_reduction <maximumf>, %1, %cst [0] : vector<4x16xf32> to vector<16xf32>
    %7 = vector.shape_cast %6 : vector<16xf32> to vector<1x16xf32>
    %8 = vector.broadcast %7 : vector<1x16xf32> to vector<4x16xf32>
    %9 = arith.subf %1, %8 : vector<4x16xf32>
    %10 = math.exp %9 : vector<4x16xf32>
    %cst_5 = arith.constant dense<0.000000e+00> : vector<16xf32>
    %11 = vector.multi_reduction <add>, %10, %cst_5 [0] : vector<4x16xf32> to vector<16xf32>
    %12 = vector.shape_cast %11 : vector<16xf32> to vector<1x16xf32>
    %13 = math.log %12 : vector<1x16xf32>
    %14 = arith.addf %7, %13 : vector<1x16xf32>
    %15 = tpu.iota {dimensions = array<i32: 0>} : vector<4x16xi32>
    %16 = vector.broadcast %4 : vector<1x16xi32> to vector<4x16xi32>
    %17 = arith.cmpi eq, %15, %16 : vector<4x16xi32>
    %cst_6 = arith.constant 0.000000e+00 : f32
    %18 = vector.broadcast %cst_6 : f32 to vector<4x16xf32>
    %19 = arith.select %17, %1, %18 : vector<4x16xi1>, vector<4x16xf32>
    %cst_7 = arith.constant dense<0.000000e+00> : vector<16xf32>
    %20 = vector.multi_reduction <add>, %19, %cst_7 [0] : vector<4x16xf32> to vector<16xf32>
    %21 = vector.shape_cast %20 : vector<16xf32> to vector<1x16xf32>
    %c2_i32 = arith.constant 2 : i32
    %22 = vector.broadcast %c2_i32 : i32 to vector<1x16xi32>
    %23 = arith.cmpi eq, %5, %22 : vector<1x16xi32>
    %24 = arith.subf %14, %21 : vector<1x16xf32>
    %c1_i32 = arith.constant 1 : i32
    %25 = vector.broadcast %c1_i32 : i32 to vector<1x16xi32>
    %26 = arith.cmpi eq, %5, %25 : vector<1x16xi32>
    %cst_8 = arith.constant 1.38629436 : f32
    %cst_9 = arith.constant 0.000000e+00 : f32
    %27 = vector.broadcast %cst_8 : f32 to vector<1x16xf32>
    %28 = vector.broadcast %cst_9 : f32 to vector<1x16xf32>
    %29 = arith.select %26, %27, %28 : vector<1x16xi1>, vector<1x16xf32>
    %30 = arith.select %23, %24, %29 : vector<1x16xi1>, vector<1x16xf32>
    %cst_10 = arith.constant dense<0.000000e+00> : vector<1xf32>
    %31 = vector.multi_reduction <add>, %30, %cst_10 [1] : vector<1x16xf32> to vector<1xf32>
    %32 = vector.shape_cast %31 : vector<1xf32> to vector<1x1xf32>
    %33 = vector.shape_cast %32 : vector<1x1xf32> to vector<1x1x1xf32>
    %34 = vector.shape_cast %33 : vector<1x1x1xf32> to vector<1x1x1xf32>
    %35 = vector.broadcast %34 : vector<1x1x1xf32> to vector<1x1x128xf32>
    %c0_11 = arith.constant 0 : index
    %c0_12 = arith.constant 0 : index
    %c0_13 = arith.constant 0 : index
    %36 = vector.load %arg4[%c0_11, %c0_12, %c0_13] : memref<1x1x128xf32, #tpu.memory_space<vmem>>, vector<1x1x128xf32>
    tpu.vector_store %arg4[%c0_11, %c0_12, %c0_13], %35 {strides = array<i32>} : memref<1x1x128xf32, #tpu.memory_space<vmem>>, vector<1x1x128xf32>,
    return
  }
  func.func @transform_0(%arg0: i32, %arg1: i32) -> (i32, i32, i32) {
    %c0_i32 = arith.constant 0 : i32
    %c0_i32_0 = arith.constant 0 : i32
    return %arg0, %c0_i32, %arg1 : i32, i32, i32
  }
  func.func @transform_1(%arg0: i32, %arg1: i32) -> (i32, i32, i32) {
    %c0_i32 = arith.constant 0 : i32
    %c0_i32_0 = arith.constant 0 : i32
    return %arg0, %c0_i32, %arg1 : i32, i32, i32
  }
  func.func @transform_2(%arg0: i32, %arg1: i32) -> (i32, i32, i32) {
    %c0_i32 = arith.constant 0 : i32
    %c0_i32_0 = arith.constant 0 : i32
    return %arg0, %c0_i32, %arg1 : i32, i32, i32
  }
}

</mosaic_0001>

<bundles_post_ra>
// kernel: tpu_custom_call.1
= control target key start
LH: loop header
LB: loop body
LE: loop exit
PB: predicated region body
PF: predicated region fallthrough
CT: control target
= control target key end

     0   :  { %7 = vsyncpa [#allocation3], 0  ;;  %s849_s0 = inlined_call_operand.hbm [shape: f32[2,4,16], index: 0, kind: input, shape index: {}]   ;;  %s850_s1 = inlined_call_operand.hbm [shape: s32[2,2,16], index: 1, kind: input, shape index: {}]   ;;  %s851_s2 = inlined_call_operand.hbm [shape: f32[2,1,128], index: 2, kind: output, shape index: {}]  }
   0x1   :  { %9 = vsyncpa [#allocation3 + $0x1], 0 }
   0x2   :  { %10 = vsyncpa [#allocation6], 0 }
   0x3   :  { %12 = vsyncpa [#allocation6 + $0x1], 0 }
   0x4   :  { %13 = vsyncpa [#allocation4], 0 }
   0x5   :  { %15 = vsyncpa [#allocation4 + $0x1], 0  ;;  %s630_s9 = smov 0   ;;  %s632_s10 = smov 0  }
   0x6   :  { %s634_s11 = smov 0   ;;  %s636_s12 = smov 0  }
   0x7   :  { %s638_s13 = smov 0   ;;  %s640_s14 = smov 0  }
   0x8 LB: > { %s377_s15 = sadd.s32 4294967295, %s609_s14   ;;  %s378_s16 = sadd.s32 4294967294, %s609_s14   ;;  %s609_s14 = sphi %s640_s14, %s21_s14   ;;  %s605_s13 = sphi %s638_s13, %s871_s13   ;;  %s601_s12 = sphi %s636_s12, %s870_s12   ;;  %s597_s11 = sphi %s634_s11, %s869_s11   ;;  %s593_s10 = sphi %s632_s10, %s868_s10   ;;  %s589_s9 = sphi %s630_s9, %s867_s9  }
   0x9   : > { %s33_s17 = sadd.s32 1, %s605_s13  ;;  %s42_s18 = sadd.s32 1, %s597_s11 }
   0xa   : > { %p35_p0 = scmp.ge.s32.totalorder %s33_s17, 2  ;;  %p49_p1 = scmp.ne.s32.totalorder %s597_s11, %s593_s10 }
   0xb   : > { %p50_p2 = scmp.eq.s32.totalorder %s609_s14, 0  ;;  %p55_p3 = scmp.ne.s32.totalorder %s593_s10, %s589_s9 }
   0xc   : > { %s873_s17 = smov (%p35_p0, %s33_s17), 0  ;;  %p56_p5 = scmp.eq.s32.totalorder %s377_s15, 0 }
   0xd   : > { %p671_p4 = por %p50_p2, %p49_p1  ;;  %s37_s20 = ssub.s32 %s605_s13, %s873_s17 }
   0xe   : > { %p109_p6 = scmp.eq.s32.totalorder %s377_s15, 1  ;;  %p40_p7 = scmp.eq.s32.totalorder %s37_s20, 0 }
   0xf   : > { %p677_p8 = por %p56_p5, %p55_p3  ;;  %p115_p10 = scmp.eq.s32.totalorder %s378_s16, 1 }
  0x10   : > { %p681_p9 = por %p109_p6, %p49_p1  ;;  %p408_p13 = scmp.lt.s32.totalorder %s609_s14, 2 }
  0x11   : > { %s855_s21 = scalar_select %p677_p8, 1, 0 }
  0x12   : > { %s856_s22 = scalar_select %p681_p9, 1, 0 }
  0x13   : > { %s686_s23 = scalar_select %p40_p7, %s597_s11, %s42_s18  }
  0x14   : > { %p688_p11 = por %p115_p10, %p55_p3  ;;  %s695_s25 = sand.u32 1, %s597_s11  }
  0x15   : > { %s381_s26 = sshll.u32 %s695_s25, 2  ;;  %s382_s27 = sshll.u32 %s605_s13, 6 }
  0x16   : > { %s857_s24 = scalar_select %p688_p11, 1, 0 }
  0x17   : > { %s702_s30 = scalar_lea.hbm %s849_s0, %s382_s27  ;;  %s139_s3 = scalar_lea.vmem [#allocation2], %s381_s26 }
  0x18   : > { %s147_s4 = sshll.u32 %s139_s3, 4  ;;  %p708_p0 = pnand %p408_p13, %p671_p4  ;;  %s704_s4 = int_to_ptr.vmem [resolvable:$true] %s147_s4 }
  0x19   : > { %s136_s6 = scalar_lea.sflag [#allocation3], %s695_s25  ;;  %s463_s7 = scalar_lea.hbm %s702_s30, 64 }
  0x1a   : > { %p464_p3 = scmp.ne.s32.totalorder %s702_s30, %s463_s7  ;;  %p465_p5 = pneg %p708_p0 }
  0x1b   : > { %s468_s16 = scalar_lea.hbm %s849_s0, 128  ;;  %p469_p4 = scmp.lt.u32.totalorder %s702_s30, %s849_s0 }
  0x1c   : > { %p466_p6 = pnand %p465_p5, %p464_p3  ;;  %p470_p10 = scmp.lt.u32.totalorder %s468_s16, %s463_s7 }
  0x1d   : > { %p472_p12 = scmp.lt.u32.totalorder %s463_s7, %s702_s30 }
  0x1e   : > { %p467_p7 = pneg %p466_p6  ;;  %p471_p13 = por %p470_p10, %p469_p4 }
  0x20   : > { %p473_p1 = por %p472_p12, %p471_p13 }
  0x22   : > { %p474_p2 = pnand %p473_p1, %p467_p7 }
  0x24   : > { %477 = shalt.err (!%p474_p2)
}
  0x25   : > { %s478_s20 = scalar_lea.vmem %s704_s4, 64  ;;  %s611_s26 = smov [#allocation2]  }
  0x26   : > { %p479_p3 = scmp.ne.s32.totalorder %s704_s4, %s478_s20  ;;  %s483_s27 = sshll.u32 %s611_s26, 4  ;;  %s484_s27 = int_to_ptr.vmem [resolvable:$false] %s483_s27 }
  0x27   : > { %s485_s28 = scalar_lea.vmem %s484_s27, 128  ;;  %p486_p9 = scmp.lt.s32.totalorder %s704_s4, %s484_s27 }
  0x28   : > { %p481_p6 = pnand %p479_p3, %p465_p5  ;;  %p487_p4 = scmp.lt.s32.totalorder %s485_s28, %s478_s20 }
  0x2a   : > { %p482_p11 = pneg %p481_p6  ;;  %p488_p10 = por %p487_p4, %p486_p9 }
  0x2c   : > { %p489_p12 = pnand %p488_p10, %p482_p11 }
  0x2e   : > { %492 = shalt.err (!%p489_p12)
}
  0x2f   : > { %400 = dma.hbm_to_vmem [thread:$0]  (!%p708_p0), %s702_s30, 64, %s704_s4, %s136_s6  }
  0x30   : > { %p859_p1 = scmp.lt.s32.totalorder %s609_s14, 3  ;;  %p860_p2 = scmp.ge.s32.totalorder %s609_s14, 1 }
  0x31   : > { %s383_s3 = sshll.u32 %s695_s25, 1  ;;  %s384_s7 = sshll.u32 %s605_s13, 5 }
  0x32   : > { %p744_p7 = pnand %p860_p2, %p859_p1  ;;  %s753_s16 = scalar_lea.hbm %s850_s1, %s384_s7 }
  0x33   : > { %s158_s18 = scalar_lea.vmem [#allocation5], %s383_s3  ;;  %s155_s30 = scalar_lea.sflag [#allocation6], %s695_s25 }
  0x34   : > { %s861_s29 = scalar_select %p744_p7, 1, 0 }
  0x35   : > { %s166_s19 = sshll.u32 %s158_s18, 4  ;;  %s493_s4 = scalar_lea.hbm %s753_s16, 32  ;;  %s167_s19 = int_to_ptr.vmem [resolvable:$true] %s166_s19 }
  0x36   : > { %p494_p9 = scmp.ne.s32.totalorder %s753_s16, %s493_s4  ;;  %s498_s26 = scalar_lea.hbm %s850_s1, 64 }
  0x37   : > { %p499_p3 = scmp.lt.u32.totalorder %s753_s16, %s850_s1  ;;  %p500_p6 = scmp.lt.u32.totalorder %s498_s26, %s493_s4 }
  0x38   : > { %p496_p11 = pnand %p494_p9, %p465_p5  ;;  %p502_p10 = scmp.lt.u32.totalorder %s493_s4, %s753_s16 }
  0x39   : > { %p501_p4 = por %p500_p6, %p499_p3 }
  0x3a   : > { %p497_p13 = pneg %p496_p11 }
  0x3b   : > { %p503_p12 = por %p502_p10, %p501_p4 }
  0x3d   : > { %p504_p1 = pnand %p503_p12, %p497_p13 }
  0x3f   : > { %507 = shalt.err (!%p504_p1)
}
  0x40   : > { %s508_s25 = scalar_lea.vmem %s167_s19, 32  ;;  %s612_s3 = smov [#allocation5]  }
  0x41   : > { %p509_p2 = scmp.ne.s32.totalorder %s167_s19, %s508_s25  ;;  %s513_s7 = sshll.u32 %s612_s3, 4  ;;  %s514_s7 = int_to_ptr.vmem [resolvable:$false] %s513_s7 }
  0x42   : > { %s515_s8 = scalar_lea.vmem %s514_s7, 64  ;;  %p516_p8 = scmp.lt.s32.totalorder %s167_s19, %s514_s7 }
  0x43   : > { %p511_p9 = pnand %p509_p2, %p465_p5  ;;  %p517_p7 = scmp.lt.s32.totalorder %s515_s8, %s508_s25 }
  0x45   : > { %p512_p11 = pneg %p511_p9  ;;  %p518_p3 = por %p517_p7, %p516_p8 }
  0x47   : > { %p519_p6 = pnand %p518_p3, %p512_p11 }
  0x49   : > { %522 = shalt.err (!%p519_p6)
}
  0x4a   : > { %403 = dma.hbm_to_vmem [thread:$0]  (!%p708_p0), %s753_s16, 32, %s167_s19, %s155_s30  }
  0x4b   : > { %p862_p13 = scmp.ne.s32.totalorder %s861_s29, 0 }
  0x4c   : > { %s778_s15 = sand.u32 (!%p862_p13), 1, %s593_s10   ;;  %p863_p5 = scmp.ne.s32.totalorder (!%p862_p13), %s855_s21, 0 }
  0x4d   : > { %175 = sbr.rel (%p862_p13) target bundleno = 305 (0x131), region = 28  ;;  %s386_s18 = sshll.u32 (!%p862_p13), %s778_s15, 2 }
  0x4e   : > { %s178_s4 = scalar_lea.sflag (!%p862_p13), [#allocation3], %s778_s15  ;;  %s181_s6 = scalar_lea.vmem (!%p862_p13), [#allocation2], %s386_s18 }
  0x54   : > { %576 = dma.done.wait (%p863_p5), %s178_s4, 64  }
  0x55   : > { %578 = vsyncadd (%p863_p5), %s178_s4, 4294967232  ;;  %s387_s5 = sshll.u32 %s778_s15, 1  ;;  %s187_s29 = scalar_lea.sflag [#allocation6], %s778_s15 }
  0x56   : > { %s190_s16 = scalar_lea.vmem [#allocation5], %s387_s5 }
  0x57   : > { %580 = dma.done.wait (%p863_p5), %s187_s29, 32  }
  0x58   : > { %582 = vsyncadd (%p863_p5), %s187_s29, 4294967264  ;;  %vm217_vm0 = vcmask 125952   ;;  %v215_v0 = vld [vmem:[%s181_s6] sm:$0xf]  ;;  %v238_v6 = vlaneseq  ;;  %v216_v13 = vld [vmem:[%s190_s16] sm:$0x3] }
  0x59   : > { %v218_v1 = vsel %vm217_vm0, %v215_v0, -inf  ;;  %vm255_vm2 = vcmp.eq.s32.totalorder %v216_v13, 1  ;;  %vm253_vm3 = vcmp.eq.s32.totalorder %v216_v13, 2  ;;  %v613_v34 = vmov 0.0   ;;  %s214_s21 = scalar_lea.vmem [#allocation7], %s778_s15  ;;  %s388_s30 = sshll.u32 %s601_s12, 4 }
  0x5a   : > { %v219_v2 = vrot.slane %v218_v1, 4  ;;  %v239_v9 = vshrl.u32 %v238_v6, 7  ;;  %v256_v35 = vsel %vm255_vm2, 1.3862944, %v613_v34  ;;  %vm258_vm4 = vcmask 123905   ;;  %s277_s19 = sshll.u32 %s214_s21, 4  ;;  %s802_s27 = scalar_lea.hbm %s851_s2, %s388_s30  ;;  %s797_s19 = int_to_ptr.vmem [resolvable:$true] %s277_s19 }
  0x5b   : > { %s264_s28 = scalar_lea.sflag [#allocation4], %s778_s15  ;;  %s523_s25 = scalar_lea.vmem %s797_s19, 16 }
  0x5c   : > { %v220_v3 = vmax.f32 %v218_v1, %v219_v2  ;;  %v242_v12 = vsub.s32 0, %v239_v9  ;;  %p524_p8 = scmp.ne.s32.totalorder %s797_s19, %s523_s25  ;;  %p864_p0 = scmp.ne.s32.totalorder %s856_s22, 0 }
  0x5d   : > { %s614_s3 = smov [#allocation7]  }
  0x5e   : > { %v221_v4 = vrot.slane %v220_v3, 2  ;;  %v243_v14 = vrot.slane %v216_v13, %v242_v12  ;;  %p525_p7 = pnand %p524_p8, %p864_p0  ;;  %s527_s12 = sshll.u32 %s614_s3, 4  ;;  %s528_s12 = int_to_ptr.vmem [resolvable:$false] %s527_s12 }
  0x5f   : > { %s529_s7 = scalar_lea.vmem %s528_s12, 32  ;;  %p530_p10 = scmp.lt.s32.totalorder %s797_s19, %s528_s12 }
  0x60   : > { %v222_v5 = vmax.f32 %v220_v3, %v221_v4  ;;  %vm244_vm1 = vcmp.eq.s32.totalorder %v239_v9, %v243_v14  ;;  %p526_p4 = pneg %p525_p7  ;;  %p531_p12 = scmp.lt.s32.totalorder %s529_s7, %s523_s25 }
  0x61   : > { %v245_v15 = vsel %vm244_vm1, %v215_v0, 0.0 }
  0x62   : > { %v223_v7 = vrot.slane %v222_v5, 1  ;;  %v246_v19 = vsel %vm217_vm0, %v245_v15, 0.0  ;;  %p532_p1 = por %p531_p12, %p530_p10 }
  0x63   : > { %v247_v21 = vrot.slane %v246_v19, 4 }
  0x64   : > { %v224_v8 = vmax.f32 %v222_v5, %v223_v7  ;;  %p533_p2 = pnand %p532_p1, %p526_p4 }
  0x65   : > { %v248_v24 = vadd.f32 %v247_v21, %v246_v19 }
  0x66   : > { %v225_v10 = vsub.f32 %v215_v0, %v224_v8 }
  0x67   : > { %v249_v27 = vrot.slane %v248_v24, 2 }
  0x68   : > { %v226_v11 = vmul.f32 1.442695, %v225_v10 }
  0x69   : > { %v250_v28 = vadd.f32 %v249_v27, %v248_v24 }
  0x6a   : > { %459 = vpow2.f32 %v226_v11 }
  0x6b   : > { %v251_v29 = vrot.slane %v250_v28, 1 }
  0x6d   : > { %v252_v32 = vadd.f32 %v251_v29, %v250_v28 }
  0x74   : > { %v460_v16 = vpop.eup %459 }
  0x75   : > { %v228_v17 = vsel %vm217_vm0, %v460_v16, 0.0 }
  0x76   : > { %v229_v18 = vrot.slane %v228_v17, 4 }
  0x78   : > { %v230_v20 = vadd.f32 %v229_v18, %v228_v17 }
  0x7a   : > { %v231_v22 = vrot.slane %v230_v20, 2 }
  0x7c   : > { %v232_v23 = vadd.f32 %v231_v22, %v230_v20 }
  0x7e   : > { %v233_v25 = vrot.slane %v232_v23, 1 }
  0x80   : > { %v234_v26 = vadd.f32 %v233_v25, %v232_v23 }
  0x82   : > { %461 = vlog2.f32 %v234_v26 }
  0x8c   : > { %v462_v30 = vpop.eup %461 }
  0x8d   : > { %v236_v31 = vmul.f32 0.6931472, %v462_v30 }
  0x8f   : > { %v237_v33 = vadd.f32 %v236_v31, %v224_v8 }
  0x91   : > { %v254_v36 = vsub.f32 %v237_v33, %v252_v32 }
  0x93   : > { %v257_v37 = vsel %vm253_vm3, %v254_v36, %v256_v35 }
  0x94   : > { %v259_v38 = vsel %vm258_vm4, %v257_v37, 0.0 }
  0x95   : > { %260 = vadd.xlane.f32.xlu0 %v259_v38 }
 0x122   : > { %v261_v39 = vpop.xlane.xlu0 %260 }
 0x123   : > { %262 = vst [vmem:[%s214_s21 - $0x1] sm:$0x2] %v261_v39 }
 0x124   : > { %536 = shalt.err (!%p533_p2)
}
 0x125   : > { %s537_s8 = scalar_lea.hbm %s802_s27, 16  ;;  %s541_s4 = scalar_lea.hbm %s851_s2, 32 }
 0x126   : > { %p538_p9 = scmp.ne.s32.totalorder %s802_s27, %s537_s8  ;;  %p542_p6 = scmp.lt.u32.totalorder %s802_s27, %s851_s2 }
 0x127   : > { %p543_p13 = scmp.lt.u32.totalorder %s541_s4, %s537_s8  ;;  %p545_p8 = scmp.lt.u32.totalorder %s537_s8, %s802_s27 }
 0x128   : > { %p539_p11 = pnand %p538_p9, %p864_p0 }
 0x129   : > { %p544_p5 = por %p543_p13, %p542_p6 }
 0x12a   : > { %p540_p3 = pneg %p539_p11 }
 0x12b   : > { %p546_p7 = por %p545_p8, %p544_p5 }
 0x12d   : > { %p547_p4 = pnand %p546_p7, %p540_p3 }
 0x12f   : > { %550 = shalt.err (!%p547_p4)
}
 0x130   : > { %395 = dma.vmem_to_hbm [thread:$0]  (%p864_p0), %s797_s19, 16, %s802_s27, %s264_s28  }
 0x131 PF: > { %s289_s29 = sand.u32 1, %s589_s9   ;;  %p865_p10 = scmp.ne.s32.totalorder %s857_s24, 0 }
 0x132   : > { %p866_p12 = scmp.ge.s32.totalorder %s609_s14, 2  ;;  %s290_s16 = scalar_lea.sflag [#allocation4], %s289_s29 }
 0x134   : > { %p405_p1 = pnand %p866_p12, %p865_p10 }
 0x136   : > { %584 = dma.done.wait (!%p405_p1), %s290_s16, 16  }
 0x137   : > { %586 = vsyncadd (!%p405_p1), %s290_s16, 4294967280  ;;  %s21_s14 = sadd.s32 1, %s609_s14   ;;  %s867_s9 = smov %s593_s10 }
 0x138   : > { %p18_p2 = scmp.ge.s32.totalorder %s21_s14, 4   ;;  %s868_s10 = smov %s597_s11 }
 0x139   : > { %s869_s11 = smov %s686_s23  ;;  %s870_s12 = smov %s605_s13 }
 0x13a   : > { %s871_s13 = smov %s873_s17  ;;  %20 = sbr.rel (!%p18_p2) target bundleno = 8 (0x8), region = 86 }
 0x141   :  { %294 = vsyncpa [#allocation3], 1 }
 0x142   :  { %296 = vsyncpa [#allocation3 + $0x1], 1 }
 0x143   :  { %297 = vsyncpa [#allocation6], 1 }
 0x144   :  { %299 = vsyncpa [#allocation6 + $0x1], 1 }
 0x145   :  { %300 = vsyncpa [#allocation4], 1 }
 0x146   :  { %302 = vsyncpa [#allocation4 + $0x1], 1 }

</bundles_post_ra>
